<compile_context>
chip_gen: v7x
topology: tpu7x:2x2x1
jax: 0.10.0
libtpu: 0.0.40
codegen_flags: <defaults>
</compile_context>

<pallas_src>
import functools

import jax
import jax.numpy as jnp
from jax.experimental import pallas as pl
from jax.experimental.pallas import tpu as pltpu

LANES = 128
MAX_TILE_ROWS = 4096   # f32: 2 MiB / operand / buffer -> 8 MiB double-buffered
CHUNK_ROWS = 512       # in-kernel accumulation chunk (64 vregs / operand)
MIN_TILES = 8          # keep both v7x TensorCores fed via the parallel grid


def _round_up(x, m):
    return ((x + m - 1) // m) * m


def _basis_flow_loss_kernel(p_ref, g_ref, out_ref, *, chunk_rows, n_chunks,
                            needs_tail_mask, valid_rows, last_tile):
    """Per-tile partial sums of per-pixel L2 flow error, folded to (8,128)."""

    def chunk_sums(c, mask_tail):
        if n_chunks == 1:
            off = 0
            p = p_ref[...]
            g = g_ref[...]
        else:
            off = pl.multiple_of(c * chunk_rows, 8)
            p = p_ref[pl.ds(off, chunk_rows), :]
            g = g_ref[pl.ds(off, chunk_rows), :]
        # Load native dtype, upcast on vregs (mandatory f32 math on v5e).
        p = p.astype(jnp.float32)
        g = g.astype(jnp.float32)
        e = g - p                        # |.| unnecessary: it gets squared
        e2 = e * e
        # Bring the partner flow component over with a lane rotation (XLU).
        pair = e2 + pltpu.roll(e2, 1, 1)
        dis = jnp.sqrt(pair)             # EUP slot
        if mask_tail:
            # Only the last (ragged) tile pays for row masking: rows past the
            # true slab extent hold undefined data (possibly NaN/Inf).
            row = jax.lax.broadcasted_iota(jnp.int32, dis.shape, 0) + off
            dis = jnp.where(row < valid_rows, dis, 0.0)
        # Fold the chunk onto 8 sublanes (layout-preserving reshape + VPU adds).
        return jnp.sum(dis.reshape(chunk_rows // 8, 8, LANES), axis=0)

    def run(mask_tail):
        if n_chunks == 1:
            acc = chunk_sums(0, mask_tail)
        else:
            acc = jax.lax.fori_loop(
                0, n_chunks,
                lambda c, a: a + chunk_sums(c, mask_tail),
                jnp.zeros((8, LANES), jnp.float32))
        # Lane-parity mask applied once per tile on a single vreg: a lane is
        # valid iff the lane rolled into it is its x/y partner (lane ^ 1).
        # Direction-agnostic w.r.t. pltpu.roll's rotation convention.
        lane = jax.lax.broadcasted_iota(jnp.int32, (8, LANES), 1)
        partner_ok = pltpu.roll(lane, 1, 1) == (lane ^ 1)
        out_ref[...] = jnp.where(partner_ok, acc, 0.0)

    if needs_tail_mask:
        is_last = pl.program_id(0) == last_tile

        @pl.when(jnp.logical_not(is_last))
        def _():
            run(False)

        @pl.when(is_last)
        def _():
            run(True)
    else:
        run(False)


def basis_flow_loss(img, homo_flow_pred, homo_flow_gt):
    """JAX/Pallas equivalent of myLoss_basis_flow.forward."""
    del img  # unused by the reference loss
    assert homo_flow_pred.shape == homo_flow_gt.shape
    assert homo_flow_pred.shape[-1] == 2, "flow tensors must have 2 channels"
    B, H, W, _ = homo_flow_pred.shape
    n_pixels = B * H * W
    total = n_pixels * 2

    rows_data = -(-total // LANES)
    if total % LANES == 0 and rows_data >= 8:
        # Common case: free lane-dense view, no padded HBM copy.
        rows_slab = rows_data

        def to_slab(x):
            return x.reshape(rows_slab, LANES)
    else:
        # Tiny / odd shapes only: zero-pad to a >=8-row slab (zeros contribute
        # exactly 0 to the sum; x/y pairs never split since total is even).
        rows_slab = max(8, _round_up(rows_data, 8))

        def to_slab(x):
            flat = x.reshape(-1)
            flat = jnp.pad(flat, (0, rows_slab * LANES - total))
            return flat.reshape(rows_slab, LANES)

    # Adaptive tile size: as large as VMEM comfortably allows, but small
    # enough that the parallel grid has >= MIN_TILES steps.
    desired = min(MAX_TILE_ROWS, max(8, -(-rows_slab // MIN_TILES)))
    if desired > CHUNK_ROWS:
        tile_rows = _round_up(desired, CHUNK_ROWS)
        chunk_rows = CHUNK_ROWS
    else:
        tile_rows = _round_up(desired, 8)
        chunk_rows = tile_rows
    n_chunks = tile_rows // chunk_rows
    num_tiles = -(-rows_slab // tile_rows)
    needs_tail_mask = (rows_slab % tile_rows) != 0
    valid_rows_last = rows_slab - (num_tiles - 1) * tile_rows

    p_slab = to_slab(homo_flow_pred)
    g_slab = to_slab(homo_flow_gt)

    in_bytes = rows_slab * LANES * (homo_flow_pred.dtype.itemsize
                                    + homo_flow_gt.dtype.itemsize)
    out_bytes = num_tiles * 8 * LANES * 4
    cost = pl.CostEstimate(
        flops=6 * rows_slab * LANES,
        transcendentals=rows_slab * LANES,
        bytes_accessed=in_bytes + out_bytes,
    )

    kernel = functools.partial(
        _basis_flow_loss_kernel,
        chunk_rows=chunk_rows,
        n_chunks=n_chunks,
        needs_tail_mask=needs_tail_mask,
        valid_rows=valid_rows_last,
        last_tile=num_tiles - 1,
    )

    partials = pl.pallas_call(
        kernel,
        out_shape=jax.ShapeDtypeStruct((num_tiles * 8, LANES), jnp.float32),
        grid=(num_tiles,),
        in_specs=[
            pl.BlockSpec((tile_rows, LANES), lambda i: (i, 0)),
            pl.BlockSpec((tile_rows, LANES), lambda i: (i, 0)),
        ],
        out_specs=pl.BlockSpec((8, LANES), lambda i: (i, 0)),
        compiler_params=pltpu.CompilerParams(
            dimension_semantics=("parallel",)),
        cost_estimate=cost,
    )(p_slab, g_slab)

    # Sum of per-pixel L2 norms / true pixel count (padding, masked lanes and
    # masked tail rows contributed exactly 0).
    return jnp.sum(partials) / jnp.float32(n_pixels)


def _reference(pred, gt):
    dis = jnp.abs(gt - pred)
    return jnp.mean(jnp.sqrt(dis[..., 0] ** 2 + dis[..., 1] ** 2))


if __name__ == "__main__":
    key = jax.random.PRNGKey(0)
    k_img, k_pred, k_gt = jax.random.split(key, 3)

    B, Cimg, H, W = 2, 3, 16, 16
    img = jax.random.normal(k_img, (B, Cimg, H, W), dtype=jnp.float32)  # unused
    homo_flow_pred = jax.random.normal(k_pred, (B, H, W, 2), dtype=jnp.float32)
    homo_flow_gt = jax.random.normal(k_gt, (B, H, W, 2), dtype=jnp.float32)

    loss = basis_flow_loss(img, homo_flow_pred, homo_flow_gt)
    jax.block_until_ready(loss)
    ref = _reference(homo_flow_pred, homo_flow_gt)
    assert jnp.allclose(loss, ref, rtol=1e-4, atol=1e-5), (loss, ref)

    # Extra shapes exercising: (a) unaligned -> zero-pad fallback,
    # (b) ragged last tile (in-kernel tail masking),
    # (c) multi-chunk fori_loop accumulation + tail masking.
    for i, shape in enumerate([(1, 5, 7, 2), (2, 48, 80, 2), (4, 321, 256, 2)]):
        kp, kg = jax.random.split(jax.random.PRNGKey(i + 1))
        p2 = jax.random.normal(kp, shape, dtype=jnp.float32)
        g2 = jax.random.normal(kg, shape, dtype=jnp.float32)
        l2 = basis_flow_loss(None, p2, g2)
        jax.block_until_ready(l2)
        r2 = _reference(p2, g2)
        assert jnp.allclose(l2, r2, rtol=1e-4, atol=1e-5), (shape, l2, r2)

    print("KERNEL_OK")
</pallas_src>

<mosaic_0001>
module attributes {stable_mosaic.version = 11 : i64} {
  func.func @_basis_flow_loss_kernel(%arg0: i32, %arg1: memref<8x128xf32, #tpu.memory_space<vmem>>, %arg2: memref<8x128xf32, #tpu.memory_space<vmem>>, %arg3: memref<8x128xf32, #tpu.memory_space<vmem>>) attributes {dimension_semantics = [#tpu.dimension_semantics<parallel>], iteration_bounds = array<i64: 1>, scalar_prefetch = 0 : i64, scratch_operands = 0 : i64, tpu.core_type = #tpu.core_type<tc>, window_params = [{transform_indices = @transform_0, window_bounds = array<i64: 8, 128>}, {transform_indices = @transform_1, window_bounds = array<i64: 8, 128>}, {transform_indices = @transform_2, window_bounds = array<i64: 8, 128>}]} {
    %c0 = arith.constant 0 : index
    %c0_0 = arith.constant 0 : index
    %0 = vector.load %arg1[%c0, %c0_0] : memref<8x128xf32, #tpu.memory_space<vmem>>, vector<8x128xf32>
    %c0_1 = arith.constant 0 : index
    %c0_2 = arith.constant 0 : index
    %1 = vector.load %arg2[%c0_1, %c0_2] : memref<8x128xf32, #tpu.memory_space<vmem>>, vector<8x128xf32>
    %2 = arith.subf %1, %0 : vector<8x128xf32>
    %3 = arith.mulf %2, %2 : vector<8x128xf32>
    %c1_i32 = arith.constant 1 : i32
    %4 = tpu.dynamic_rotate %3 by %c1_i32 dim 1 : vector<8x128xf32>, i32 -> vector<8x128xf32>
    %5 = arith.addf %3, %4 : vector<8x128xf32>
    %6 = math.sqrt %5 : vector<8x128xf32>
    %7 = vector.shape_cast %6 : vector<8x128xf32> to vector<1x8x128xf32>
    %cst = arith.constant dense<0.000000e+00> : vector<8x128xf32>
    %8 = vector.multi_reduction <add>, %7, %cst [0] : vector<1x8x128xf32> to vector<8x128xf32>
    %9 = tpu.iota {dimensions = array<i32: 1>} : vector<8x128xi32>
    %c1_i32_3 = arith.constant 1 : i32
    %10 = tpu.dynamic_rotate %9 by %c1_i32_3 dim 1 : vector<8x128xi32>, i32 -> vector<8x128xi32>
    %c1_i32_4 = arith.constant 1 : i32
    %11 = vector.broadcast %c1_i32_4 : i32 to vector<8x128xi32>
    %12 = arith.xori %9, %11 : vector<8x128xi32>
    %13 = arith.cmpi eq, %10, %12 : vector<8x128xi32>
    %cst_5 = arith.constant 0.000000e+00 : f32
    %14 = vector.broadcast %cst_5 : f32 to vector<8x128xf32>
    %15 = arith.select %13, %8, %14 : vector<8x128xi1>, vector<8x128xf32>
    %c0_6 = arith.constant 0 : index
    %c0_7 = arith.constant 0 : index
    %16 = vector.load %arg3[%c0_6, %c0_7] : memref<8x128xf32, #tpu.memory_space<vmem>>, vector<8x128xf32>
    tpu.vector_store %arg3[%c0_6, %c0_7], %15 {strides = array<i32>} : memref<8x128xf32, #tpu.memory_space<vmem>>, vector<8x128xf32>,
    return
  }
  func.func @transform_0(%arg0: i32) -> (i32, i32) {
    %c0_i32 = arith.constant 0 : i32
    %c0_i32_0 = arith.constant 0 : i32
    return %arg0, %c0_i32 : i32, i32
  }
  func.func @transform_1(%arg0: i32) -> (i32, i32) {
    %c0_i32 = arith.constant 0 : i32
    %c0_i32_0 = arith.constant 0 : i32
    return %arg0, %c0_i32 : i32, i32
  }
  func.func @transform_2(%arg0: i32) -> (i32, i32) {
    %c0_i32 = arith.constant 0 : i32
    %c0_i32_0 = arith.constant 0 : i32
    return %arg0, %c0_i32 : i32, i32
  }
}

</mosaic_0001>

<bundles_post_ra>
// kernel: tpu_custom_call.1
= control target key start
LH: loop header
LB: loop body
LE: loop exit
PB: predicated region body
PF: predicated region fallthrough
CT: control target
= control target key end

     0   :  { %7 = vsyncpa [#allocation3], 0  ;;  %s208_s0 = inlined_call_operand.hbm [shape: f32[8,128], index: 0, kind: input, shape index: {}]   ;;  %s209_s1 = inlined_call_operand.hbm [shape: f32[8,128], index: 1, kind: input, shape index: {}]   ;;  %s210_s2 = inlined_call_operand.hbm [shape: f32[8,128], index: 2, kind: output, shape index: {}]  }
   0x1   :  { %8 = vsyncpa [#allocation6], 0 }
   0x2   :  { %9 = vsyncpa [#allocation4], 0  ;;  %s153_s9 = smov [#allocation2]   ;;  %s154_s11 = smov [#allocation5]  }
   0x3   :  { %s16_s10 = sshll.u32 %s153_s9, 4  ;;  %s26_s12 = sshll.u32 %s154_s11, 4  ;;  %s17_s10 = int_to_ptr.vmem [resolvable:$true] %s16_s10  ;;  %s27_s12 = int_to_ptr.vmem [resolvable:$true] %s26_s12 }
   0x4   :  { %s81_s15 = scalar_lea.hbm %s208_s0, 128 }
   0x5   :  { %p82_p0 = scmp.ne.s32.totalorder %s208_s0, %s81_s15  ;;  %p85_p1 = scmp.lt.u32.totalorder %s81_s15, %s208_s0 }
   0x7   :  { %p87_p2 = pnand %p85_p1, %p82_p0 }
   0x9   :  { %90 = shalt.err (!%p87_p2)
}
   0xa   :  { %s91_s20 = scalar_lea.vmem %s17_s10, 128  ;;  %p96_p4 = scmp.lt.s32.totalorder %s17_s10, %s17_s10 }
   0xb   :  { %p92_p3 = scmp.ne.s32.totalorder %s17_s10, %s91_s20  ;;  %p97_p5 = scmp.lt.s32.totalorder %s91_s20, %s91_s20 }
   0xd   :  { %p98_p6 = por %p97_p5, %p96_p4 }
   0xf   :  { %p99_p7 = pnand %p98_p6, %p92_p3 }
  0x11   :  { %102 = shalt.err (!%p99_p7)
}
  0x12   :  { %19 = dma.hbm_to_vmem [thread:$0]  %s208_s0, 128, %s17_s10, [#allocation3]  }
  0x13   :  { %s103_s25 = scalar_lea.hbm %s209_s1, 128 }
  0x14   :  { %p104_p8 = scmp.ne.s32.totalorder %s209_s1, %s103_s25  ;;  %p107_p9 = scmp.lt.u32.totalorder %s103_s25, %s209_s1 }
  0x16   :  { %p109_p10 = pnand %p107_p9, %p104_p8 }
  0x18   :  { %112 = shalt.err (!%p109_p10)
}
  0x19   :  { %s113_s30 = scalar_lea.vmem %s27_s12, 128  ;;  %p118_p12 = scmp.lt.s32.totalorder %s27_s12, %s27_s12 }
  0x1a   :  { %p114_p11 = scmp.ne.s32.totalorder %s27_s12, %s113_s30  ;;  %p119_p13 = scmp.lt.s32.totalorder %s113_s30, %s113_s30 }
  0x1c   :  { %p120_p0 = por %p119_p13, %p118_p12 }
  0x1e   :  { %p121_p1 = pnand %p120_p0, %p114_p11 }
  0x20   :  { %124 = shalt.err (!%p121_p1)
}
  0x21   :  { %29 = dma.hbm_to_vmem [thread:$0]  %s209_s1, 128, %s27_s12, [#allocation6]  }
  0x22   :  { %147 = dma.done.wait [#allocation3], 128  }
  0x23   :  { %148 = vsyncadd [#allocation3], 4294967168 }
  0x24   :  { %149 = dma.done.wait [#allocation6], 128  }
  0x25   :  { %150 = vsyncadd [#allocation6], 4294967168  ;;  %v36_v0 = vld [vmem:[#allocation2] sm:$0xff]  ;;  %v37_v1 = vld [vmem:[#allocation5] sm:$0xff]  ;;  %v51_v3 = vlaneseq  ;;  %s155_s4 = smov 1   ;;  %s156_s1 = smov [#allocation7]  }
  0x26   :  { %v38_v2 = vsub.f32 %v37_v1, %v36_v0  ;;  %s65_s5 = sshll.u32 %s156_s1, 4  ;;  %s66_s5 = int_to_ptr.vmem [resolvable:$true] %s65_s5 }
  0x27   :  { %v52_v5 = vand.u32 127, %v51_v3  ;;  %s125_s6 = scalar_lea.vmem %s66_s5, 128  ;;  %p130_p3 = scmp.lt.s32.totalorder %s66_s5, %s66_s5 }
  0x28   :  { %v39_v4 = vmul.f32 %v38_v2, %v38_v2  ;;  %p126_p2 = scmp.ne.s32.totalorder %s66_s5, %s125_s6  ;;  %p131_p4 = scmp.lt.s32.totalorder %s125_s6, %s125_s6 }
  0x29   :  { %v55_v8 = vxor.u32 1, %v52_v5 }
  0x2a   :  { %40 = vrot.lane.b32.xlu0 %v39_v4, %s155_s4  ;;  %p132_p5 = por %p131_p4, %p130_p3 }
  0x2c   :  { %p133_p6 = pnand %p132_p5, %p126_p2 }
  0x2e   :  { %53 = vrot.lane.b32.xlu0 %v52_v5, %s155_s4 }
  0x9c   :  { %v41_v6 = vpop.permute.xlu0 %40 }
  0x9d   :  { %v42_v7 = vadd.f32 %v41_v6, %v39_v4 }
  0x9f   :  { %79 = vrsqrt.f32 %v42_v7  ;;  %vm45_vm0 = vcmp.eq.f32.partialorder %v42_v7, inf  ;;  %v48_v12 = vand.u32 2147483648, %v42_v7  ;;  %vm47_vm2 = vcmp.eq.f32.partialorder %v42_v7, 0.0 }
  0xa0   :  { %v54_v9 = vpop.permute.xlu0 %53 }
  0xa1   :  { %vm56_vm1 = vcmp.eq.s32.totalorder %v54_v9, %v55_v8 }
  0xa9   :  { %v80_v10 = vpop.eup %79 }
  0xaa   :  { %v44_v11 = vmul.f32 %v80_v10, %v42_v7 }
  0xac   :  { %v46_v13 = vsel %vm45_vm0, %v42_v7, %v44_v11 }
  0xad   :  { %v49_v14 = vsel %vm47_vm2, %v48_v12, %v46_v13 }
  0xae   :  { %v57_v15 = vsel %vm56_vm1, %v49_v14, 0.0 }
  0xaf   :  { %58 = vst [vmem:[#allocation7] sm:$0xff] %v57_v15 }
  0xb0   :  { %136 = shalt.err (!%p133_p6)
}
  0xb1   :  { %s137_s9 = scalar_lea.hbm %s210_s2, 128 }
  0xb2   :  { %p138_p7 = scmp.ne.s32.totalorder %s210_s2, %s137_s9  ;;  %p141_p8 = scmp.lt.u32.totalorder %s137_s9, %s210_s2 }
  0xb4   :  { %p143_p9 = pnand %p141_p8, %p138_p7 }
  0xb6   :  { %146 = shalt.err (!%p143_p9)
}
  0xb7   :  { %68 = dma.vmem_to_hbm [thread:$0]  %s66_s5, 128, %s210_s2, [#allocation4]  }
  0xb8   :  { %151 = dma.done.wait [#allocation4], 128  }
  0xb9   :  { %152 = vsyncadd [#allocation4], 4294967168 }
  0xba   :  { %72 = vsyncpa [#allocation3], 1 }
  0xbb   :  { %73 = vsyncpa [#allocation6], 1 }
  0xbc   :  { %74 = vsyncpa [#allocation4], 1 }

</bundles_post_ra>
